<compile_context>
chip_gen: v5e
topology: v5e:2x2
jax: 0.10.0
libtpu: 0.0.40
codegen_flags: <defaults>
</compile_context>

<pallas_src>
import functools

import jax
import jax.numpy as jnp
import numpy as np
from jax import lax
from jax.experimental import pallas as pl
from jax.experimental.pallas import tpu as pltpu


def _layernorm(x, w, b, eps):
    # x: (N, D); w, b: (1, D)
    mu = jnp.mean(x, axis=-1, keepdims=True)
    xc = x - mu
    var = jnp.mean(xc * xc, axis=-1, keepdims=True)
    return xc * lax.rsqrt(var + eps) * w + b


def encoder_layer_kernel(
    x_ref,       # (N, D)   N = S*B rows, (seq-major, batch-minor) order
    mask_ref,    # (N, N)   additive bias: 0 same-batch, -1e30 cross-batch
    in_w_ref,    # (3D, D)  packed q/k/v weight, PyTorch (out, in) layout
    in_b_ref,    # (3D, 1)  packed q/k/v bias
    wo_t_ref,    # (D, D)   out_proj weight transposed -> (in, out)
    w1_ref,      # (F, D)   linear1 weight (out, in)
    b1_ref,      # (1, F)
    w2_ref,      # (D, F)   linear2 weight (out, in)
    pvec_ref,    # (6, D)   [out_proj_b, ln1_w, ln1_b, linear2_b, ln2_w, ln2_b]
    o_ref,       # (N, D)
    *,
    nhead: int,
    eps: float,
):
    N, D = x_ref.shape
    dh = D // nhead
    scale = 1.0 / float(np.sqrt(dh))

    x = x_ref[...]
    pvec = pvec_ref[...]
    bo, ln1w, ln1b, b2, ln2w, ln2b = (pvec[i:i + 1, :] for i in range(6))

    # "A @ B.T" for 2-D operands: consumes (out_features, in_features) weights
    # directly, no transposes inside the kernel.
    ab_t = (((1,), (1,)), ((), ()))

    # ---- packed QKV projection: ONE MXU dot for all of q, k, v and all rows.
    qkvT = lax.dot_general(in_w_ref[...], x, ab_t,
                           preferred_element_type=jnp.float32)      # (3D, N)
    qkvT = qkvT + in_b_ref[...]
    qT = qkvT[0:D] * scale                                          # (D, N)
    kT = qkvT[D:2 * D]
    vT = qkvT[2 * D:3 * D]
    q3 = qT.reshape(nhead, dh, N)                                   # free sublane split
    k3 = kT.reshape(nhead, dh, N)
    v3 = vT.reshape(nhead, dh, N)

    # ---- scores: one head-batched dot, batch folded into the N axis.
    # TODO(synk): for large B/S switch to a grid over batch (and drop the
    # O((S*B)^2) cross-batch mask) with dimension_semantics=("parallel",) to
    # engage the second TensorCore on v7x.
    s = lax.dot_general(q3, k3, (((1,), (1,)), ((0,), (0,))),
                        preferred_element_type=jnp.float32)         # (H, N, N)
    s = s + mask_ref[...]                                           # kill cross-batch
    s = s - jnp.max(s, axis=-1, keepdims=True)
    p = jnp.exp(s)
    p = p / jnp.sum(p, axis=-1, keepdims=True)      # exact divide (no approx recip)

    # ---- PV in head-major transposed form; the (H, dh, N) -> (D, N) reshape
    #      is the head concat for free on the sublane axis; out_proj is one
    #      2-D dot producing (N, D) directly (no (H, N, D) intermediate, no
    #      head-sum).
    ctxT = lax.dot_general(v3, p, (((2,), (2,)), ((0,), (0,))),
                           preferred_element_type=jnp.float32)      # (H, dh, N)
    ctx = ctxT.reshape(D, N)                                        # (D, N)
    sa = lax.dot_general(ctx, wo_t_ref[...], (((0,), (0,)), ((), ())),
                         preferred_element_type=jnp.float32)        # (N, D)
    sa = sa + bo
    # dropout1 -> identity (inference)

    # ---- norm1(x + sa(x))
    x1 = _layernorm(x + sa, ln1w, ln1b, eps)

    # ---- feed-forward: linear1 -> relu -> linear2 (dropouts identity)
    # TODO(synk): at production sizes (D>=1024, F>=4096) tile the FFN over F
    # with a grid axis + pl.Buffered(1) weights and set vmem_limit_bytes
    # (v7x has only 64 MiB VMEM); and cast MXU inputs to bf16 once
    # compute-bound on v6e/v7x.
    h = lax.dot_general(x1, w1_ref[...], ab_t,
                        preferred_element_type=jnp.float32)         # (N, F)
    h = jnp.maximum(h + b1_ref[...], 0.0)
    ff = lax.dot_general(h, w2_ref[...], ab_t,
                         preferred_element_type=jnp.float32)        # (N, D)
    ff = ff + b2

    # ---- norm2(x1 + ff(x1)) : one contiguous store for all batches.
    o_ref[...] = _layernorm(x1 + ff, ln2w, ln2b, eps)


def my_transformer_encoder_layer(src, params, *, nhead, eps=1e-5):
    """src: (S, B, D) float32 (PyTorch batch_first=False). Returns (S, B, D)."""
    S, B, D = src.shape
    F_dim = params["linear1_w"].shape[0]
    N = S * B

    # Free, contiguous reshape: rows ordered (seq-major, batch-minor).
    x_flat = src.reshape(N, D)

    # One-time wrapper-side parameter packing (no per-step kernel work).
    in_w = params["in_proj_w"]                         # (3D, D), packed q/k/v
    in_b = params["in_proj_b"].reshape(3 * D, 1)
    wo_t = params["out_proj_w"].T                      # (D_in, D_out)
    b1 = params["linear1_b"].reshape(1, F_dim)
    pvec = jnp.stack(
        [params["out_proj_b"], params["norm1_w"], params["norm1_b"],
         params["linear2_b"], params["norm2_w"], params["norm2_b"]],
        axis=0)                                        # (6, D)

    # Additive attention bias so batches folded into N do not attend across
    # batch boundaries (batch id of flattened row i is i % B).
    bids = jnp.tile(jnp.arange(B, dtype=jnp.int32), S)           # (N,)
    mask = jnp.where(bids[:, None] == bids[None, :], 0.0, -1e30)
    mask = mask.astype(jnp.float32)                              # (N, N)

    def full(shape):
        return pl.BlockSpec(shape, lambda i: (0,) * len(shape))

    out = pl.pallas_call(
        functools.partial(encoder_layer_kernel, nhead=nhead, eps=eps),
        out_shape=jax.ShapeDtypeStruct((N, D), jnp.float32),
        grid_spec=pltpu.PrefetchScalarGridSpec(
            num_scalar_prefetch=0,
            grid=(1,),
            in_specs=[
                full((N, D)),            # x
                full((N, N)),            # cross-batch mask bias
                full((3 * D, D)),        # packed in_proj weight
                full((3 * D, 1)),        # packed in_proj bias
                full((D, D)),            # out_proj weight^T
                full((F_dim, D)),        # linear1 weight
                full((1, F_dim)),        # linear1 bias
                full((D, F_dim)),        # linear2 weight
                full((6, D)),            # packed small params
            ],
            out_specs=full((N, D)),
        ),
        compiler_params=pltpu.CompilerParams(
            dimension_semantics=("arbitrary",)),
    )(x_flat, mask, in_w, in_b, wo_t,
      params["linear1_w"], b1, params["linear2_w"], pvec)
    return out.reshape(S, B, D)


# ----------------------- pure-JAX reference (for checking) -----------------
def _ref_forward(src, params, *, nhead, eps=1e-5):
    S, B, D = src.shape
    dh = D // nhead
    hp = jax.lax.Precision.HIGHEST
    x = jnp.transpose(src, (1, 0, 2))              # (B, S, D)

    def ln(v, w, b):
        mu = jnp.mean(v, -1, keepdims=True)
        var = jnp.mean((v - mu) ** 2, -1, keepdims=True)
        return (v - mu) / jnp.sqrt(var + eps) * w + b

    qkv = jnp.einsum("bsd,ed->bse", x, params["in_proj_w"],
                     precision=hp) + params["in_proj_b"]
    q, k, v = jnp.split(qkv, 3, axis=-1)
    q = q.reshape(B, S, nhead, dh).transpose(0, 2, 1, 3) / np.sqrt(dh)
    k = k.reshape(B, S, nhead, dh).transpose(0, 2, 1, 3)
    v = v.reshape(B, S, nhead, dh).transpose(0, 2, 1, 3)
    a = jax.nn.softmax(jnp.einsum("bhqd,bhkd->bhqk", q, k, precision=hp), axis=-1)
    o = jnp.einsum("bhqk,bhkd->bhqd", a, v,
                   precision=hp).transpose(0, 2, 1, 3).reshape(B, S, D)
    sa = jnp.einsum("bsd,ed->bse", o, params["out_proj_w"],
                    precision=hp) + params["out_proj_b"]
    x1 = ln(x + sa, params["norm1_w"], params["norm1_b"])
    h = jax.nn.relu(jnp.einsum("bsd,fd->bsf", x1, params["linear1_w"],
                               precision=hp) + params["linear1_b"])
    ff = jnp.einsum("bsf,df->bsd", h, params["linear2_w"],
                    precision=hp) + params["linear2_b"]
    x2 = ln(x1 + ff, params["norm2_w"], params["norm2_b"])
    return jnp.transpose(x2, (1, 0, 2))


if __name__ == "__main__":
    # Small config consistent with the module: d_model=32, nhead=4,
    # dim_feedforward=64, seq=8, batch=2.
    S, B, D, H, FF = 8, 2, 32, 4, 64

    key = jax.random.PRNGKey(0)
    keys = jax.random.split(key, 8)

    params = {
        "in_proj_w": 0.05 * jax.random.normal(keys[0], (3 * D, D), jnp.float32),
        "in_proj_b": 0.01 * jax.random.normal(keys[1], (3 * D,), jnp.float32),
        "out_proj_w": 0.05 * jax.random.normal(keys[2], (D, D), jnp.float32),
        "out_proj_b": jnp.zeros((D,), jnp.float32),
        "linear1_w": 0.05 * jax.random.normal(keys[3], (FF, D), jnp.float32),
        "linear1_b": 0.01 * jax.random.normal(keys[4], (FF,), jnp.float32),
        "linear2_w": 0.05 * jax.random.normal(keys[5], (D, FF), jnp.float32),
        "linear2_b": 0.01 * jax.random.normal(keys[6], (D,), jnp.float32),
        "norm1_w": jnp.ones((D,), jnp.float32),
        "norm1_b": jnp.zeros((D,), jnp.float32),
        "norm2_w": jnp.ones((D,), jnp.float32),
        "norm2_b": jnp.zeros((D,), jnp.float32),
    }

    src = jax.random.normal(keys[7], (S, B, D), jnp.float32)

    out = my_transformer_encoder_layer(src, params, nhead=H)
    out = jax.block_until_ready(out)

    ref = _ref_forward(src, params, nhead=H)
    # Exact softmax divide (no approx reciprocal) -> back to 1e-4-level
    # agreement with the full-precision reference.
    np.testing.assert_allclose(np.asarray(out), np.asarray(ref),
                               rtol=1e-4, atol=1e-4)

    print("KERNEL_OK")
</pallas_src>

<mosaic_0001>
module attributes {stable_mosaic.version = 11 : i64} {
  func.func @encoder_layer_kernel(%arg0: i32, %arg1: memref<16x32xf32, #tpu.memory_space<vmem>>, %arg2: memref<16x16xf32, #tpu.memory_space<vmem>>, %arg3: memref<96x32xf32, #tpu.memory_space<vmem>>, %arg4: memref<96x1xf32, #tpu.memory_space<vmem>>, %arg5: memref<32x32xf32, #tpu.memory_space<vmem>>, %arg6: memref<64x32xf32, #tpu.memory_space<vmem>>, %arg7: memref<1x64xf32, #tpu.memory_space<vmem>>, %arg8: memref<32x64xf32, #tpu.memory_space<vmem>>, %arg9: memref<6x32xf32, #tpu.memory_space<vmem>>, %arg10: memref<16x32xf32, #tpu.memory_space<vmem>>) attributes {dimension_semantics = [#tpu.dimension_semantics<arbitrary>], iteration_bounds = array<i64: 1>, scalar_prefetch = 0 : i64, scratch_operands = 0 : i64, tpu.core_type = #tpu.core_type<tc>, window_params = [{pipeline_mode = #tpu.pipeline_mode<synchronous>, transform_indices = @transform_0, window_bounds = array<i64: 16, 32>}, {pipeline_mode = #tpu.pipeline_mode<synchronous>, transform_indices = @transform_1, window_bounds = array<i64: 16, 16>}, {pipeline_mode = #tpu.pipeline_mode<synchronous>, transform_indices = @transform_2, window_bounds = array<i64: 96, 32>}, {pipeline_mode = #tpu.pipeline_mode<synchronous>, transform_indices = @transform_3, window_bounds = array<i64: 96, 1>}, {pipeline_mode = #tpu.pipeline_mode<synchronous>, transform_indices = @transform_4, window_bounds = array<i64: 32, 32>}, {pipeline_mode = #tpu.pipeline_mode<synchronous>, transform_indices = @transform_5, window_bounds = array<i64: 64, 32>}, {pipeline_mode = #tpu.pipeline_mode<synchronous>, transform_indices = @transform_6, window_bounds = array<i64: 1, 64>}, {pipeline_mode = #tpu.pipeline_mode<synchronous>, transform_indices = @transform_7, window_bounds = array<i64: 32, 64>}, {pipeline_mode = #tpu.pipeline_mode<synchronous>, transform_indices = @transform_8, window_bounds = array<i64: 6, 32>}, {pipeline_mode = #tpu.pipeline_mode<synchronous>, transform_indices = @transform_9, window_bounds = array<i64: 16, 32>}]} {
    %c0 = arith.constant 0 : index
    %c0_0 = arith.constant 0 : index
    %0 = vector.load %arg1[%c0, %c0_0] : memref<16x32xf32, #tpu.memory_space<vmem>>, vector<16x32xf32>
    %c0_1 = arith.constant 0 : index
    %c0_2 = arith.constant 0 : index
    %1 = vector.load %arg9[%c0_1, %c0_2] : memref<6x32xf32, #tpu.memory_space<vmem>>, vector<6x32xf32>
    %2 = vector.extract_strided_slice %1 {offsets = [0, 0], sizes = [1, 32], strides = [1, 1]} : vector<6x32xf32> to vector<1x32xf32>
    %3 = vector.extract_strided_slice %1 {offsets = [1, 0], sizes = [1, 32], strides = [1, 1]} : vector<6x32xf32> to vector<1x32xf32>
    %4 = vector.extract_strided_slice %1 {offsets = [2, 0], sizes = [1, 32], strides = [1, 1]} : vector<6x32xf32> to vector<1x32xf32>
    %5 = vector.extract_strided_slice %1 {offsets = [3, 0], sizes = [1, 32], strides = [1, 1]} : vector<6x32xf32> to vector<1x32xf32>
    %6 = vector.extract_strided_slice %1 {offsets = [4, 0], sizes = [1, 32], strides = [1, 1]} : vector<6x32xf32> to vector<1x32xf32>
    %7 = vector.extract_strided_slice %1 {offsets = [5, 0], sizes = [1, 32], strides = [1, 1]} : vector<6x32xf32> to vector<1x32xf32>
    %c0_3 = arith.constant 0 : index
    %c0_4 = arith.constant 0 : index
    %8 = vector.load %arg3[%c0_3, %c0_4] : memref<96x32xf32, #tpu.memory_space<vmem>>, vector<96x32xf32>
    %cst = arith.constant dense<0.000000e+00> : vector<96x16xf32>
    %9 = tpu.matmul %8, %0, %cst {dimension_numbers = #tpu.dot_dimension_numbers<[1], [1], [0], [0], [0, 0, 1, 0], [], []>} : vector<96x32xf32>, vector<16x32xf32>, vector<96x16xf32> -> vector<96x16xf32>
    %c0_5 = arith.constant 0 : index
    %c0_6 = arith.constant 0 : index
    %10 = vector.load %arg4[%c0_5, %c0_6] : memref<96x1xf32, #tpu.memory_space<vmem>>, vector<96x1xf32>
    %11 = vector.broadcast %10 : vector<96x1xf32> to vector<96x16xf32>
    %12 = arith.addf %9, %11 : vector<96x16xf32>
    %13 = vector.extract_strided_slice %12 {offsets = [0, 0], sizes = [32, 16], strides = [1, 1]} : vector<96x16xf32> to vector<32x16xf32>
    %cst_7 = arith.constant 0.353553385 : f32
    %14 = vector.broadcast %cst_7 : f32 to vector<32x16xf32>
    %15 = arith.mulf %13, %14 : vector<32x16xf32>
    %16 = vector.extract_strided_slice %12 {offsets = [32, 0], sizes = [32, 16], strides = [1, 1]} : vector<96x16xf32> to vector<32x16xf32>
    %17 = vector.extract_strided_slice %12 {offsets = [64, 0], sizes = [32, 16], strides = [1, 1]} : vector<96x16xf32> to vector<32x16xf32>
    %18 = vector.shape_cast %15 : vector<32x16xf32> to vector<4x8x16xf32>
    %19 = vector.shape_cast %16 : vector<32x16xf32> to vector<4x8x16xf32>
    %20 = vector.shape_cast %17 : vector<32x16xf32> to vector<4x8x16xf32>
    %cst_8 = arith.constant dense<0.000000e+00> : vector<4x16x16xf32>
    %21 = tpu.matmul %18, %19, %cst_8 {dimension_numbers = #tpu.dot_dimension_numbers<[1], [1], [2], [2], [0, 0, 0, 2, 1, 2], [0], [0]>} : vector<4x8x16xf32>, vector<4x8x16xf32>, vector<4x16x16xf32> -> vector<4x16x16xf32>
    %c0_9 = arith.constant 0 : index
    %c0_10 = arith.constant 0 : index
    %22 = vector.load %arg2[%c0_9, %c0_10] : memref<16x16xf32, #tpu.memory_space<vmem>>, vector<16x16xf32>
    %23 = vector.shape_cast %22 : vector<16x16xf32> to vector<1x16x16xf32>
    %24 = vector.broadcast %23 : vector<1x16x16xf32> to vector<4x16x16xf32>
    %25 = arith.addf %21, %24 : vector<4x16x16xf32>
    %cst_11 = arith.constant dense<0xFF800000> : vector<4x16xf32>
    %26 = vector.multi_reduction <maximumf>, %25, %cst_11 [2] : vector<4x16x16xf32> to vector<4x16xf32>
    %27 = vector.shape_cast %26 : vector<4x16xf32> to vector<4x16x1xf32>
    %28 = vector.broadcast %27 : vector<4x16x1xf32> to vector<4x16x16xf32>
    %29 = arith.subf %25, %28 : vector<4x16x16xf32>
    %30 = math.exp %29 : vector<4x16x16xf32>
    %cst_12 = arith.constant dense<0.000000e+00> : vector<4x16xf32>
    %31 = vector.multi_reduction <add>, %30, %cst_12 [2] : vector<4x16x16xf32> to vector<4x16xf32>
    %32 = vector.shape_cast %31 : vector<4x16xf32> to vector<4x16x1xf32>
    %33 = vector.broadcast %32 : vector<4x16x1xf32> to vector<4x16x16xf32>
    %34 = arith.divf %30, %33 : vector<4x16x16xf32>
    %cst_13 = arith.constant dense<0.000000e+00> : vector<4x8x16xf32>
    %35 = tpu.matmul %20, %34, %cst_13 {dimension_numbers = #tpu.dot_dimension_numbers<[2], [2], [1], [1], [0, 0, 0, 1, 1, 1], [0], [0]>} : vector<4x8x16xf32>, vector<4x16x16xf32>, vector<4x8x16xf32> -> vector<4x8x16xf32>
    %36 = vector.shape_cast %35 : vector<4x8x16xf32> to vector<32x16xf32>
    %c0_14 = arith.constant 0 : index
    %c0_15 = arith.constant 0 : index
    %37 = vector.load %arg5[%c0_14, %c0_15] : memref<32x32xf32, #tpu.memory_space<vmem>>, vector<32x32xf32>
    %cst_16 = arith.constant dense<0.000000e+00> : vector<16x32xf32>
    %38 = tpu.matmul %36, %37, %cst_16 {dimension_numbers = #tpu.dot_dimension_numbers<[0], [0], [1], [1], [0, 1, 1, 1], [], []>} : vector<32x16xf32>, vector<32x32xf32>, vector<16x32xf32> -> vector<16x32xf32>
    %39 = vector.broadcast %2 : vector<1x32xf32> to vector<16x32xf32>
    %40 = arith.addf %38, %39 : vector<16x32xf32>
    %41 = arith.addf %0, %40 : vector<16x32xf32>
    %cst_17 = arith.constant dense<0.000000e+00> : vector<16xf32>
    %42 = vector.multi_reduction <add>, %41, %cst_17 [1] : vector<16x32xf32> to vector<16xf32>
    %43 = vector.shape_cast %42 : vector<16xf32> to vector<16x1xf32>
    %cst_18 = arith.constant 3.200000e+01 : f32
    %44 = vector.broadcast %cst_18 : f32 to vector<16x1xf32>
    %45 = arith.divf %43, %44 : vector<16x1xf32>
    %46 = vector.broadcast %45 : vector<16x1xf32> to vector<16x32xf32>
    %47 = arith.subf %41, %46 : vector<16x32xf32>
    %48 = arith.mulf %47, %47 : vector<16x32xf32>
    %cst_19 = arith.constant dense<0.000000e+00> : vector<16xf32>
    %49 = vector.multi_reduction <add>, %48, %cst_19 [1] : vector<16x32xf32> to vector<16xf32>
    %50 = vector.shape_cast %49 : vector<16xf32> to vector<16x1xf32>
    %cst_20 = arith.constant 3.200000e+01 : f32
    %51 = vector.broadcast %cst_20 : f32 to vector<16x1xf32>
    %52 = arith.divf %50, %51 : vector<16x1xf32>
    %cst_21 = arith.constant 9.99999974E-6 : f32
    %53 = vector.broadcast %cst_21 : f32 to vector<16x1xf32>
    %54 = arith.addf %52, %53 : vector<16x1xf32>
    %55 = math.rsqrt %54 : vector<16x1xf32>
    %56 = vector.broadcast %55 : vector<16x1xf32> to vector<16x32xf32>
    %57 = arith.mulf %47, %56 : vector<16x32xf32>
    %58 = vector.broadcast %3 : vector<1x32xf32> to vector<16x32xf32>
    %59 = arith.mulf %57, %58 : vector<16x32xf32>
    %60 = vector.broadcast %4 : vector<1x32xf32> to vector<16x32xf32>
    %61 = arith.addf %59, %60 : vector<16x32xf32>
    %c0_22 = arith.constant 0 : index
    %c0_23 = arith.constant 0 : index
    %62 = vector.load %arg6[%c0_22, %c0_23] : memref<64x32xf32, #tpu.memory_space<vmem>>, vector<64x32xf32>
    %cst_24 = arith.constant dense<0.000000e+00> : vector<16x64xf32>
    %63 = tpu.matmul %61, %62, %cst_24 {dimension_numbers = #tpu.dot_dimension_numbers<[1], [1], [0], [0], [0, 0, 1, 0], [], []>} : vector<16x32xf32>, vector<64x32xf32>, vector<16x64xf32> -> vector<16x64xf32>
    %c0_25 = arith.constant 0 : index
    %c0_26 = arith.constant 0 : index
    %64 = vector.load %arg7[%c0_25, %c0_26] : memref<1x64xf32, #tpu.memory_space<vmem>>, vector<1x64xf32>
    %65 = vector.broadcast %64 : vector<1x64xf32> to vector<16x64xf32>
    %66 = arith.addf %63, %65 : vector<16x64xf32>
    %cst_27 = arith.constant 0.000000e+00 : f32
    %67 = vector.broadcast %cst_27 : f32 to vector<16x64xf32>
    %68 = arith.maximumf %66, %67 : vector<16x64xf32>
    %c0_28 = arith.constant 0 : index
    %c0_29 = arith.constant 0 : index
    %69 = vector.load %arg8[%c0_28, %c0_29] : memref<32x64xf32, #tpu.memory_space<vmem>>, vector<32x64xf32>
    %cst_30 = arith.constant dense<0.000000e+00> : vector<16x32xf32>
    %70 = tpu.matmul %68, %69, %cst_30 {dimension_numbers = #tpu.dot_dimension_numbers<[1], [1], [0], [0], [0, 0, 1, 0], [], []>} : vector<16x64xf32>, vector<32x64xf32>, vector<16x32xf32> -> vector<16x32xf32>
    %71 = vector.broadcast %5 : vector<1x32xf32> to vector<16x32xf32>
    %72 = arith.addf %70, %71 : vector<16x32xf32>
    %73 = arith.addf %61, %72 : vector<16x32xf32>
    %cst_31 = arith.constant dense<0.000000e+00> : vector<16xf32>
    %74 = vector.multi_reduction <add>, %73, %cst_31 [1] : vector<16x32xf32> to vector<16xf32>
    %75 = vector.shape_cast %74 : vector<16xf32> to vector<16x1xf32>
    %cst_32 = arith.constant 3.200000e+01 : f32
    %76 = vector.broadcast %cst_32 : f32 to vector<16x1xf32>
    %77 = arith.divf %75, %76 : vector<16x1xf32>
    %78 = vector.broadcast %77 : vector<16x1xf32> to vector<16x32xf32>
    %79 = arith.subf %73, %78 : vector<16x32xf32>
    %80 = arith.mulf %79, %79 : vector<16x32xf32>
    %cst_33 = arith.constant dense<0.000000e+00> : vector<16xf32>
    %81 = vector.multi_reduction <add>, %80, %cst_33 [1] : vector<16x32xf32> to vector<16xf32>
    %82 = vector.shape_cast %81 : vector<16xf32> to vector<16x1xf32>
    %cst_34 = arith.constant 3.200000e+01 : f32
    %83 = vector.broadcast %cst_34 : f32 to vector<16x1xf32>
    %84 = arith.divf %82, %83 : vector<16x1xf32>
    %cst_35 = arith.constant 9.99999974E-6 : f32
    %85 = vector.broadcast %cst_35 : f32 to vector<16x1xf32>
    %86 = arith.addf %84, %85 : vector<16x1xf32>
    %87 = math.rsqrt %86 : vector<16x1xf32>
    %88 = vector.broadcast %87 : vector<16x1xf32> to vector<16x32xf32>
    %89 = arith.mulf %79, %88 : vector<16x32xf32>
    %90 = vector.broadcast %6 : vector<1x32xf32> to vector<16x32xf32>
    %91 = arith.mulf %89, %90 : vector<16x32xf32>
    %92 = vector.broadcast %7 : vector<1x32xf32> to vector<16x32xf32>
    %93 = arith.addf %91, %92 : vector<16x32xf32>
    %c0_36 = arith.constant 0 : index
    %c0_37 = arith.constant 0 : index
    %94 = vector.load %arg10[%c0_36, %c0_37] : memref<16x32xf32, #tpu.memory_space<vmem>>, vector<16x32xf32>
    tpu.vector_store %arg10[%c0_36, %c0_37], %93 {strides = array<i32>} : memref<16x32xf32, #tpu.memory_space<vmem>>, vector<16x32xf32>,
    return
  }
  func.func @transform_0(%arg0: i32) -> (i32, i32) {
    %c0_i32 = arith.constant 0 : i32
    %c0_i32_0 = arith.constant 0 : i32
    %c0_i32_1 = arith.constant 0 : i32
    return %c0_i32, %c0_i32_0 : i32, i32
  }
  func.func @transform_1(%arg0: i32) -> (i32, i32) {
    %c0_i32 = arith.constant 0 : i32
    %c0_i32_0 = arith.constant 0 : i32
    %c0_i32_1 = arith.constant 0 : i32
    return %c0_i32, %c0_i32_0 : i32, i32
  }
  func.func @transform_2(%arg0: i32) -> (i32, i32) {
    %c0_i32 = arith.constant 0 : i32
    %c0_i32_0 = arith.constant 0 : i32
    %c0_i32_1 = arith.constant 0 : i32
    return %c0_i32, %c0_i32_0 : i32, i32
  }
  func.func @transform_3(%arg0: i32) -> (i32, i32) {
    %c0_i32 = arith.constant 0 : i32
    %c0_i32_0 = arith.constant 0 : i32
    %c0_i32_1 = arith.constant 0 : i32
    return %c0_i32, %c0_i32_0 : i32, i32
  }
  func.func @transform_4(%arg0: i32) -> (i32, i32) {
    %c0_i32 = arith.constant 0 : i32
    %c0_i32_0 = arith.constant 0 : i32
    %c0_i32_1 = arith.constant 0 : i32
    return %c0_i32, %c0_i32_0 : i32, i32
  }
  func.func @transform_5(%arg0: i32) -> (i32, i32) {
    %c0_i32 = arith.constant 0 : i32
    %c0_i32_0 = arith.constant 0 : i32
    %c0_i32_1 = arith.constant 0 : i32
    return %c0_i32, %c0_i32_0 : i32, i32
  }
  func.func @transform_6(%arg0: i32) -> (i32, i32) {
    %c0_i32 = arith.constant 0 : i32
    %c0_i32_0 = arith.constant 0 : i32
    %c0_i32_1 = arith.constant 0 : i32
    return %c0_i32, %c0_i32_0 : i32, i32
  }
  func.func @transform_7(%arg0: i32) -> (i32, i32) {
    %c0_i32 = arith.constant 0 : i32
    %c0_i32_0 = arith.constant 0 : i32
    %c0_i32_1 = arith.constant 0 : i32
    return %c0_i32, %c0_i32_0 : i32, i32
  }
  func.func @transform_8(%arg0: i32) -> (i32, i32) {
    %c0_i32 = arith.constant 0 : i32
    %c0_i32_0 = arith.constant 0 : i32
    %c0_i32_1 = arith.constant 0 : i32
    return %c0_i32, %c0_i32_0 : i32, i32
  }
  func.func @transform_9(%arg0: i32) -> (i32, i32) {
    %c0_i32 = arith.constant 0 : i32
    %c0_i32_0 = arith.constant 0 : i32
    %c0_i32_1 = arith.constant 0 : i32
    return %c0_i32, %c0_i32_0 : i32, i32
  }
}

</mosaic_0001>

<bundles_post_ra>
// kernel: tpu_custom_call.1
= control target key start
LH: loop header
LB: loop body
LE: loop exit
PB: predicated region body
PF: predicated region fallthrough
CT: control target
= control target key end

     0   :  { %vm120_vm0 = vcmask 261120   ;;  %v1219_v2 = vmov 0   ;;  %s1608_s0 = inlined_call_operand.vmem [shape: f32[16,32], index: 0, kind: input, shape index: {}]   ;;  %s1609_s1 = inlined_call_operand.vmem [shape: f32[16,16], index: 1, kind: input, shape index: {}]   ;;  %s1610_s2 = inlined_call_operand.vmem [shape: f32[96,32], index: 2, kind: input, shape index: {}]   ;;  %s1611_s3 = inlined_call_operand.vmem [shape: f32[96,1], index: 3, kind: input, shape index: {}]   ;;  %s1612_s4 = inlined_call_operand.vmem [shape: f32[32,32], index: 4, kind: input, shape index: {}]   ;;  %s1613_s5 = inlined_call_operand.vmem [shape: f32[64,32], index: 5, kind: input, shape index: {}]   ;;  %s1614_s6 = inlined_call_operand.vmem [shape: f32[1,64], index: 6, kind: input, shape index: {}]   ;;  %s1615_s7 = inlined_call_operand.vmem [shape: f32[32,64], index: 7, kind: input, shape index: {}]   ;;  %s1616_s8 = inlined_call_operand.vmem [shape: f32[6,32], index: 8, kind: input, shape index: {}]   ;;  %s1617_s9 = inlined_call_operand.hbm [shape: f32[16,32], index: 9, kind: output, shape index: {}]  }
   0x1   :  { %v1277_v0 = vld [vmem:[%s1608_s0 + $0x8] sm:$0xff]  ;;  %v48_v1 = vld [vmem:[%s1611_s3] sm:$0xff]  ;;  %1147 = vset.pattern.permute.xlu0 %v1219_v2  ;;  %1148 = vset.pattern.permute.xlu1 %v1219_v2  ;;  %v50_v4 = vld [vmem:[%s1611_s3 + $0x10] sm:$0xff] }
   0x2   :  { %1087 = vmatpush.xpose.msk.msra.mxu0 %vm120_vm0, %v1277_v0  ;;  %62 = vperm.xlu0 %1147, %v48_v1   ;;  %v1287_v3 = vld [vmem:[%s1608_s0] sm:$0xff] }
   0x3   :  { %72 = vperm.xlu1 %1148, %v50_v4   ;;  %1149 = vset.pattern.permute.xlu2 %v1219_v2 }
   0x4   :  { %1139 = vmatpush.xpose.msk.msra.mxu1 %vm120_vm0, %v1277_v0 }
   0x5   :  { %14 = vsyncpa [#allocation3], 0  ;;  %v36_v5 = vld [vmem:[%s1610_s2] sm:$0xff]  ;;  %v49_v6 = vld [vmem:[%s1611_s3 + $0x8] sm:$0xff]  ;;  %vm254_vm1 = vcmask 64512   ;;  %vm467_vm2 = vcmask 130048  }
   0x6   :  { %1088 = vmatpush.xpose.msk.msra.mxu0 %vm120_vm0, %v1287_v3  ;;  %v51_v7 = vld [vmem:[%s1611_s3 + $0x18] sm:$0xff]  ;;  %v37_v8 = vld [vmem:[%s1610_s2 + $0x8] sm:$0xff]  ;;  %v54_v9 = vld [vmem:[%s1611_s3 + $0x30] sm:$0xff]  ;;  %s1223_s27 = smov 8  }
   0x7   :  { %v55_v10 = vld [vmem:[%s1611_s3 + $0x38] sm:$0xff]  ;;  %v38_v11 = vld [vmem:[%s1610_s2 + $0x10] sm:$0xff]  ;;  %v52_v13 = vld [vmem:[%s1611_s3 + $0x20] sm:$0xff] }
   0x8   :  { %1140 = vmatpush.xpose.msk.msra.mxu1 %vm120_vm0, %v1287_v3  ;;  %v39_v12 = vld [vmem:[%s1610_s2 + $0x18] sm:$0xff]  ;;  %82 = vperm.xlu2 %1149, %v52_v13   ;;  %v40_v14 = vld [vmem:[%s1610_s2 + $0x20] sm:$0xff]  ;;  %v53_v15 = vld [vmem:[%s1611_s3 + $0x28] sm:$0xff] }
   0x9   :  { %1089 = vmatmul.msk.f32.vlgmr.msra.gmra.mxu0 %vm120_vm0, %v36_v5  ;;  %v41_v16 = vld [vmem:[%s1610_s2 + $0x28] sm:$0xff]  ;;  %v42_v17 = vld [vmem:[%s1610_s2 + $0x30] sm:$0xff]  ;;  %v43_v18 = vld [vmem:[%s1610_s2 + $0x38] sm:$0xff] }
   0xa   :  { %67 = vperm.xlu0 %1147, %v49_v6   ;;  %v45_v34 = vld [vmem:[%s1610_s2 + $0x48] sm:$0xff]  ;;  %v46_v37 = vld [vmem:[%s1610_s2 + $0x50] sm:$0xff]  ;;  %v47_v41 = vld [vmem:[%s1610_s2 + $0x58] sm:$0xff] }
   0xb   :  { %77 = vperm.xlu1 %1148, %v51_v7   ;;  %1098 = vmatmul.msk.f32.vlgmr.msra.gmra.mxu1 %vm120_vm0, %v45_v34  ;;  %v220_v61 = vld [vmem:[%s1609_s1] sm:$0xff]  ;;  %v221_v2 = vld [vmem:[%s1609_s1 + $0x8] sm:$0xff] }
  0x10   :  { %87 = vperm.xlu2 %1149, %v53_v15  }
  0x11   :  { %1090 = vmatmul.msk.f32.gmra.mxu0 %vm120_vm0, %v37_v8 }
  0x12   :  { %92 = vperm.xlu0 %1147, %v54_v9  }
  0x13   :  { %97 = vperm.xlu1 %1148, %v55_v10   ;;  %1099 = vmatmul.msk.f32.gmra.mxu1 %vm120_vm0, %v46_v37 }
  0x19   :  { %1091 = vmatmul.msk.f32.gmra.mxu0 %vm120_vm0, %v38_v11 }
  0x1b   :  { %1100 = vmatmul.msk.f32.gmra.mxu1 %vm120_vm0, %v47_v41 }
  0x21   :  { %1092 = vmatmul.msk.f32.gmra.mxu0 %vm120_vm0, %v39_v12 }
  0x29   :  { %1093 = vmatmul.msk.f32.gmra.mxu0 %vm120_vm0, %v40_v14 }
  0x31   :  { %1094 = vmatmul.msk.f32.gmra.mxu0 %vm120_vm0, %v41_v16 }
  0x39   :  { %1095 = vmatmul.msk.f32.gmra.mxu0 %vm120_vm0, %v42_v17 }
  0x41   :  { %1096 = vmatmul.msk.f32.gmra.mxu0 %vm120_vm0, %v43_v18 }
  0x62   :  { %v83_v36 = vpop.permute.xlu2 %82 }
  0x6a   :  { %v88_v40 = vpop.permute.xlu2 %87 }
  0x74   :  { %v63_v19 = vpop.permute.xlu0 %62 }
  0x75   :  { %v73_v27 = vpop.permute.xlu1 %72 }
  0x7c   :  { %v68_v23 = vpop.permute.xlu0 %67 }
  0x7d   :  { %v78_v31 = vpop.permute.xlu1 %77 }
  0x84   :  { %v93_v44 = vpop.permute.xlu0 %92 }
  0x85   :  { %v98_v47 = vpop.permute.xlu1 %97 }
  0x86   :  { %v180_v20 = vpop.f32.mrf.mxu0 }
  0x87   :  { %v181_v21 = vadd.f32 %v180_v20, %v63_v19 }
  0x88   :  { %v1368_v58 = vpop.f32.mrf.mxu1 }
  0x89   :  { %v216_v22 = vmul.f32 0.35355338, %v181_v21 }
  0x8b   :  { %222 = vxpose.xlu2.b32.start.end [1/1] (short) (narrow) %v216_v22, 16 }
  0x8e   :  { %v183_v24 = vpop.f32.mrf.mxu0 }
  0x8f   :  { %v184_v25 = vadd.f32 %v183_v24, %v68_v23 }
  0x90   :  { %v1370_v59 = vpop.f32.mrf.mxu1 }
  0x91   :  { %v217_v26 = vmul.f32 0.35355338, %v184_v25 }
  0x93   :  { %284 = vxpose.xlu0.b32.start.end [1/1] (short) (narrow) %v217_v26, 16 }
  0x96   :  { %v186_v28 = vpop.f32.mrf.mxu0 }
  0x97   :  { %v187_v29 = vadd.f32 %v186_v28, %v73_v27 }
  0x98   :  { %v1372_v60 = vpop.f32.mrf.mxu1 }
  0x99   :  { %v218_v30 = vmul.f32 0.35355338, %v187_v29 }
  0x9b   :  { %345 = vxpose.xlu1.b32.start.end [1/1] (short) (narrow) %v218_v30, 16 }
  0x9e   :  { %v189_v32 = vpop.f32.mrf.mxu0 }
  0x9f   :  { %v190_v33 = vadd.f32 %v189_v32, %v78_v31 }
  0xa1   :  { %v219_v35 = vmul.f32 0.35355338, %v190_v33  ;;  %v44_v33 = vld [vmem:[%s1610_s2 + $0x40] sm:$0xff] }
  0xa2   :  { %1097 = vmatmul.msk.f32.gmra.mxu0 %vm120_vm0, %v44_v33 }
  0xa3   :  { %406 = vxpose.xlu2.b32.start.end [1/1] (short) (narrow) %v219_v35, 16 }
  0xa6   :  { %v192_v38 = vpop.f32.mrf.mxu0 }
  0xa7   :  { %v193_v39 = vadd.f32 %v192_v38, %v83_v36 }
  0xa9   :  { %276 = vmatpush.msrb.mxu1 %v193_v39 }
  0xae   :  { %v195_v42 = vpop.f32.mrf.mxu0 }
  0xaf   :  { %v196_v43 = vadd.f32 %v195_v42, %v88_v40 }
  0xb1   :  { %337 = vmatpush.msra.mxu2 %v196_v43 }
  0xb6   :  { %v198_v45 = vpop.f32.mrf.mxu0 }
  0xb7   :  { %v199_v46 = vadd.f32 %v198_v45, %v93_v44 }
  0xb9   :  { %398 = vmatpush.msra.mxu3 %v199_v46 }
  0xbe   :  { %v201_v48 = vpop.f32.mrf.mxu0 }
  0xbf   :  { %v202_v49 = vadd.f32 %v201_v48, %v98_v47 }
  0xc1   :  { %459 = vmatpush.msra.mxu1 %v202_v49 }
 0x124   :  { %v238_v50 = vpop.trf.xlu2 }
 0x125   :  { %1101 = vmatmul.msk.f32.vlgmr.msrb.gmra.mxu1 %vm254_vm1, %v238_v50 }
 0x12c   :  { %v239_v51 = vpop.trf.xlu2 }
 0x12d   :  { %1102 = vmatmul.msk.f32.gmra.mxu1 %vm254_vm1, %v239_v51 }
 0x137   :  { %v300_v52 = vpop.trf.xlu0 }
 0x138   :  { %1103 = vmatmul.msk.f32.vlgmr.msra.gmra.mxu2 %vm254_vm1, %v300_v52 }
 0x13c   :  { %v422_v53 = vpop.trf.xlu2 }
 0x13d   :  { %1107 = vmatmul.msk.f32.vlgmr.msra.gmra.mxu1 %vm254_vm1, %v422_v53 }
 0x13f   :  { %v361_v54 = vpop.trf.xlu1  ;;  %v301_v55 = vpop.trf.xlu0 }
 0x140   :  { %1104 = vmatmul.msk.f32.gmra.mxu2 %vm254_vm1, %v301_v55  ;;  %1105 = vmatmul.msk.f32.vlgmr.msra.gmra.mxu3 %vm254_vm1, %v361_v54 }
 0x144   :  { %v423_v56 = vpop.trf.xlu2 }
 0x145   :  { %1108 = vmatmul.msk.f32.gmra.mxu1 %vm254_vm1, %v423_v56 }
 0x147   :  { %v362_v57 = vpop.trf.xlu1 }
 0x148   :  { %1106 = vmatmul.msk.f32.gmra.mxu3 %vm254_vm1, %v362_v57 }
 0x1a2   :  { %v278_v62 = vpop.f32.mrf.mxu1 }
 0x1a3   :  { %v279_v63 = vadd.f32 %v278_v62, %v220_v61 }
 0x1a5   :  { %v468_v1 = vsel %vm467_vm2, %v279_v63, -inf }
 0x1a6   :  { %469 = vmax.xlane.f32.xlu1 %v468_v1 }
 0x1aa   :  { %v281_v4 = vpop.f32.mrf.mxu1 }
 0x1ab   :  { %v282_v5 = vadd.f32 %v281_v4, %v221_v2 }
 0x1ad   :  { %v471_v6 = vsel %vm467_vm2, %v282_v5, -inf }
 0x1ae   :  { %472 = vmax.xlane.f32.xlu0 %v471_v6 }
 0x1ba   :  { %v461_v7 = vpop.f32.mrf.mxu1 }
 0x1bb   :  { %v339_v8 = vpop.f32.mrf.mxu2  ;;  %v462_v18 = vadd.f32 %v461_v7, %v220_v61  ;;  %v56_v7 = vld [vmem:[%s1611_s3 + $0x40] sm:$0xff] }
 0x1bc   :  { %v340_v9 = vadd.f32 %v339_v8, %v220_v61  ;;  %v57_v8 = vld [vmem:[%s1611_s3 + $0x48] sm:$0xff] }
 0x1bd   :  { %v486_v21 = vsel %vm467_vm2, %v462_v18, -inf }
 0x1be   :  { %v474_v10 = vsel %vm467_vm2, %v340_v9, -inf }
 0x1bf   :  { %475 = vmax.xlane.f32.xlu0 %v474_v10  ;;  %v59_v10 = vld [vmem:[%s1611_s3 + $0x58] sm:$0xff] }
 0x1c2   :  { %v464_v11 = vpop.f32.mrf.mxu1 }
 0x1c3   :  { %v342_v12 = vpop.f32.mrf.mxu2  ;;  %v400_v13 = vpop.f32.mrf.mxu3  ;;  %v465_v14 = vadd.f32 %v464_v11, %v221_v2 }
 0x1c4   :  { %v343_v15 = vadd.f32 %v342_v12, %v221_v2  ;;  %v401_v23 = vadd.f32 %v400_v13, %v220_v61 }
 0x1c5   :  { %v489_v16 = vsel %vm467_vm2, %v465_v14, -inf }
 0x1c6   :  { %v477_v17 = vsel %vm467_vm2, %v343_v15, -inf  ;;  %v480_v24 = vsel %vm467_vm2, %v401_v23, -inf }
 0x1c7   :  { %478 = vmax.xlane.f32.xlu2 %v477_v17  ;;  %490 = vmax.xlane.f32.xlu0 %v489_v16 }
 0x1cb   :  { %v403_v19 = vpop.f32.mrf.mxu3 }
 0x1cc   :  { %v404_v20 = vadd.f32 %v403_v19, %v221_v2 }
 0x1ce   :  { %v483_v22 = vsel %vm467_vm2, %v404_v20, -inf }
 0x1cf   :  { %484 = vmax.xlane.f32.xlu1 %v483_v22  ;;  %487 = vmax.xlane.f32.xlu2 %v486_v21 }
 0x1d7   :  { %481 = vmax.xlane.f32.xlu1 %v480_v24 }
 0x219   :  { %v470_v25 = vpop.xlane.xlu1 %469 }
 0x21a   :  { %v492_v26 = vsub.f32 %v279_v63, %v470_v25 }
 0x21c   :  { %v500_v27 = vmul.f32 1.442695, %v492_v26 }
 0x21e   :  { %1151 = vpow2.f32 %v500_v27 }
 0x221   :  { %v473_v28 = vpop.xlane.xlu0 %472 }
 0x222   :  { %v493_v29 = vsub.f32 %v282_v5, %v473_v28 }
 0x224   :  { %v1388_v30 = vpop.eup %1151  ;;  %v502_v31 = vmul.f32 1.442695, %v493_v29 }
 0x225   :  { %v516_v32 = vsel %vm467_vm2, %v1388_v30, 0.0 }
 0x226   :  { %1153 = vpow2.f32 %v502_v31  ;;  %517 = vadd.xlane.f32.xlu2 %v516_v32 }
 0x22c   :  { %v1396_v34 = vpop.eup %1153 }
 0x22d   :  { %v519_v35 = vsel %vm467_vm2, %v1396_v34, 0.0 }
 0x22e   :  { %520 = vadd.xlane.f32.xlu0 %v519_v35 }
 0x232   :  { %v476_v36 = vpop.xlane.xlu0 %475 }
 0x233   :  { %v494_v37 = vsub.f32 %v340_v9, %v476_v36  ;;  %v58_v9 = vld [vmem:[%s1611_s3 + $0x50] sm:$0xff] }
 0x235   :  { %v504_v38 = vmul.f32 1.442695, %v494_v37 }
 0x237   :  { %1155 = vpow2.f32 %v504_v38 }
 0x23a   :  { %v491_v39 = vpop.xlane.xlu0 %490  ;;  %v479_v40 = vpop.xlane.xlu2 %478 }
 0x23b   :  { %v499_v41 = vsub.f32 %v465_v14, %v491_v39  ;;  %v495_v42 = vsub.f32 %v343_v15, %v479_v40 }
 0x23d   :  { %v1400_v43 = vpop.eup %1155  ;;  %v514_v44 = vmul.f32 1.442695, %v499_v41  ;;  %v506_v45 = vmul.f32 1.442695, %v495_v42 }
 0x23e   :  { %v522_v46 = vsel %vm467_vm2, %v1400_v43, 0.0 }
 0x23f   :  { %1157 = vpow2.f32 %v514_v44  ;;  %523 = vadd.xlane.f32.xlu0 %v522_v46 }
 0x240   :  { %1159 = vpow2.f32 %v506_v45 }
 0x242   :  { %v485_v47 = vpop.xlane.xlu1 %484  ;;  %v488_v48 = vpop.xlane.xlu2 %487 }
 0x243   :  { %v498_v49 = vsub.f32 %v462_v18, %v488_v48  ;;  %v497_v53 = vsub.f32 %v404_v20, %v485_v47 }
 0x245   :  { %v1404_v50 = vpop.eup %1157  ;;  %v512_v51 = vmul.f32 1.442695, %v498_v49  ;;  %v510_v56 = vmul.f32 1.442695, %v497_v53 }
 0x246   :  { %v1406_v52 = vpop.eup %1159  ;;  %v537_v54 = vsel %vm467_vm2, %v1404_v50, 0.0 }
 0x247   :  { %538 = vadd.xlane.f32.xlu2 %v537_v54  ;;  %v525_v55 = vsel %vm467_vm2, %v1406_v52, 0.0  ;;  %1161 = vpow2.f32 %v512_v51 }
 0x248   :  { %526 = vadd.xlane.f32.xlu1 %v525_v55  ;;  %1163 = vpow2.f32 %v510_v56 }
 0x24a   :  { %v482_v57 = vpop.xlane.xlu1 %481 }
 0x24b   :  { %v496_v61 = vsub.f32 %v401_v23, %v482_v57 }
 0x24d   :  { %v508_v62 = vmul.f32 1.442695, %v496_v61  ;;  %v1412_v63 = vpop.eup %1161 }
 0x24e   :  { %v534_v1 = vsel %vm467_vm2, %v1412_v63, 0.0  ;;  %v1416_v2 = vpop.eup %1163 }
 0x24f   :  { %1165 = vpow2.f32 %v508_v62  ;;  %v531_v6 = vsel %vm467_vm2, %v1416_v2, 0.0 }
 0x250   :  { %535 = vadd.xlane.f32.xlu1 %v534_v1 }
 0x255   :  { %v1418_v4 = vpop.eup %1165 }
 0x256   :  { %v528_v5 = vsel %vm467_vm2, %v1418_v4, 0.0 }
 0x257   :  { %529 = vadd.xlane.f32.xlu0 %v528_v5 }
 0x258   :  { %532 = vadd.xlane.f32.xlu1 %v531_v6 }
 0x25f   :  { %102 = vperm.xlu2 %1149, %v56_v7  }
 0x26b   :  { %107 = vperm.xlu0 %1147, %v57_v8  }
 0x271   :  { %112 = vperm.xlu1 %1148, %v58_v9  }
 0x273   :  { %117 = vperm.xlu0 %1147, %v59_v10  }
 0x299   :  { %v518_v11 = vpop.xlane.xlu2 %517 }
 0x29a   :  { %1167 = vrcp.f32 %v518_v11  ;;  %vm545_vm5 = vweird.f32 %v518_v11  ;;  %v551_v24 = vand.u32 2147483648, %v518_v11  ;;  %v549_v26 = vand.u32 2147483647, %v518_v11 }
 0x29c   :  { %v552_v31 = vor.u32 1.1754944e-38, %v551_v24  ;;  %vm550_vm10 = vcmp.eq.f32.partialorder %v549_v26, 8.507059e+37 }
 0x2a0   :  { %v1168_v12 = vpop.eup %1167 }
 0x2a1   :  { %v541_v13 = vmul.f32 %v1168_v12, %v518_v11  ;;  %v521_v14 = vpop.xlane.xlu0 %520  ;;  %vm546_vm3 = vweird.f32 %v1168_v12 }
 0x2a2   :  { %1169 = vrcp.f32 %v521_v14  ;;  %v566_v20 = vand.u32 2147483648, %v521_v14  ;;  %v564_v22 = vand.u32 2147483647, %v521_v14  ;;  %vm560_vm6 = vweird.f32 %v521_v14  ;;  %vm547_vm7 = vmor %vm545_vm5, %vm546_vm3 }
 0x2a3   :  { %v542_v15 = vsub.f32 1.0, %v541_v13 }
 0x2a4   :  { %v567_v27 = vor.u32 1.1754944e-38, %v566_v20  ;;  %vm565_vm9 = vcmp.eq.f32.partialorder %v564_v22, 8.507059e+37 }
 0x2a5   :  { %v543_v17 = vmul.f32 %v1168_v12, %v542_v15 }
 0x2a7   :  { %v544_v23 = vadd.f32 %v1168_v12, %v543_v17 }
 0x2a8   :  { %v1170_v16 = vpop.eup %1169 }
 0x2a9   :  { %v556_v18 = vmul.f32 %v1170_v16, %v521_v14  ;;  %vm561_vm4 = vweird.f32 %v1170_v16  ;;  %v548_v29 = vsel %vm547_vm7, %v1168_v12, %v544_v23  ;;  %v1520_v14 = vld [vmem:[%s1616_s8] sm:$0x3f]  ;;  %s1222_s8 = smov 128  }
 0x2aa   :  { %vm562_vm8 = vmor %vm560_vm6, %vm561_vm4  ;;  %v553_v36 = vsel %vm550_vm10, %v552_v31, %v548_v29 }
 0x2ab   :  { %v557_v19 = vsub.f32 1.0, %v556_v18  ;;  %v554_v37 = vmul.f32 %v1388_v30, %v553_v36 }
 0x2ad   :  { %v558_v21 = vmul.f32 %v1170_v16, %v557_v19 }
 0x2af   :  { %v559_v25 = vadd.f32 %v1170_v16, %v558_v21 }
 0x2b1   :  { %v563_v28 = vsel %vm562_vm8, %v1170_v16, %v559_v25 }
 0x2b2   :  { %v1436_v32 = vpop.xlane.xlu0 %523  ;;  %v568_v33 = vsel %vm565_vm9, %v567_v27, %v563_v28 }
 0x2b3   :  { %v569_v35 = vmul.f32 %v1396_v34, %v568_v33  ;;  %1171 = vrcp.f32 %v1436_v32  ;;  %v204_v34 = vpop.f32.mrf.mxu0  ;;  %v581_v55 = vand.u32 2147483648, %v1436_v32  ;;  %vm575_vm11 = vweird.f32 %v1436_v32 }
 0x2b4   :  { %v579_v1 = vand.u32 2147483647, %v1436_v32 }
 0x2b5   :  { %1109 = vmatpush.xpose.msk.msrb.mxu2 %vm467_vm2, %v569_v35  ;;  %v582_v6 = vor.u32 1.1754944e-38, %v581_v55 }
 0x2b6   :  { %vm580_vm8 = vcmp.eq.f32.partialorder %v579_v1, 8.507059e+37 }
 0x2b9   :  { %1110 = vmatpush.xpose.msk.msrb.mxu2 %vm467_vm2, %v554_v37  ;;  %v1443_v39 = vpop.eup %1171 }
 0x2ba   :  { %v539_v38 = vpop.xlane.xlu2 %538  ;;  %v571_v41 = vmul.f32 %v1443_v39, %v1436_v32  ;;  %vm576_vm12 = vweird.f32 %v1443_v39 }
 0x2bb   :  { %v527_v40 = vpop.xlane.xlu1 %526  ;;  %1173 = vrcp.f32 %v539_v38  ;;  %vm650_vm1 = vweird.f32 %v539_v38  ;;  %v656_v13 = vand.u32 2147483648, %v539_v38  ;;  %vm1461_vm3 = vmor %vm575_vm11, %vm576_vm12  ;;  %v654_v16 = vand.u32 2147483647, %v539_v38 }
 0x2bc   :  { %1175 = vrcp.f32 %v527_v40  ;;  %v572_v45 = vsub.f32 1.0, %v571_v41  ;;  %v596_v61 = vand.u32 2147483648, %v527_v40  ;;  %v594_v62 = vand.u32 2147483647, %v527_v40 }
 0x2bd   :  { %vm590_vm15 = vweird.f32 %v527_v40  ;;  %v657_v26 = vor.u32 1.1754944e-38, %v656_v13  ;;  %vm655_vm9 = vcmp.eq.f32.partialorder %v654_v16, 8.507059e+37 }
 0x2be   :  { %v573_v54 = vmul.f32 %v1443_v39, %v572_v45  ;;  %v597_v15 = vor.u32 1.1754944e-38, %v596_v61  ;;  %vm595_vm5 = vcmp.eq.f32.partialorder %v594_v62, 8.507059e+37 }
 0x2c0   :  { %v574_v9 = vadd.f32 %v1443_v39, %v573_v54 }
 0x2c1   :  { %v1174_v42 = vpop.eup %1173 }
 0x2c2   :  { %v1176_v44 = vpop.eup %1175  ;;  %v646_v46 = vmul.f32 %v1174_v42, %v539_v38  ;;  %v103_v47 = vpop.permute.xlu2 %102  ;;  %vm651_vm14 = vweird.f32 %v1174_v42  ;;  %v578_v22 = vsel %vm1461_vm3, %v1443_v39, %v574_v9 }
 0x2c3   :  { %v586_v48 = vmul.f32 %v1176_v44, %v527_v40  ;;  %v536_v49 = vpop.xlane.xlu1 %535  ;;  %v205_v30 = vadd.f32 %v204_v34, %v103_v47  ;;  %vm591_vm13 = vweird.f32 %v1176_v44  ;;  %vm1466_vm6 = vmor %vm650_vm1, %vm651_vm14  ;;  %v583_v31 = vsel %vm580_vm8, %v582_v6, %v578_v22 }
 0x2c4   :  { %v647_v51 = vsub.f32 1.0, %v646_v46  ;;  %1177 = vrcp.f32 %v536_v49  ;;  %vm592_vm4 = vmor %vm590_vm15, %vm591_vm13  ;;  %v639_v19 = vand.u32 2147483647, %v536_v49  ;;  %v641_v20 = vand.u32 2147483648, %v536_v49 }
 0x2c5   :  { %v587_v53 = vsub.f32 1.0, %v586_v48  ;;  %1111 = vmatmul.msk.f32.vlgmr.msrb.gmra.mxu2 %vm467_vm2, %v205_v30  ;;  %vm635_vm10 = vweird.f32 %v536_v49 }
 0x2c6   :  { %v648_v57 = vmul.f32 %v1174_v42, %v647_v51  ;;  %v642_v35 = vor.u32 1.1754944e-38, %v641_v20  ;;  %vm640_vm12 = vcmp.eq.f32.partialorder %v639_v19, 8.507059e+37 }
 0x2c7   :  { %v588_v56 = vmul.f32 %v1176_v44, %v587_v53 }
 0x2c8   :  { %v649_v10 = vadd.f32 %v1174_v42, %v648_v57 }
 0x2c9   :  { %v589_v8 = vadd.f32 %v1176_v44, %v588_v56 }
 0x2ca   :  { %v1178_v5 = vpop.eup %1177  ;;  %v1453_v7 = vpop.xlane.xlu0 %529  ;;  %v653_v23 = vsel %vm1466_vm6, %v1174_v42, %v649_v10 }
 0x2cb   :  { %v631_v11 = vmul.f32 %v1178_v5, %v536_v49  ;;  %1179 = vrcp.f32 %v1453_v7  ;;  %v533_v12 = vpop.xlane.xlu1 %532  ;;  %v593_v21 = vsel %vm592_vm4, %v1176_v44, %v589_v8  ;;  %vm636_vm7 = vweird.f32 %v1178_v5 }
 0x2cc   :  { %1181 = vrcp.f32 %v533_v12  ;;  %v598_v25 = vsel %vm595_vm5, %v597_v15, %v593_v21  ;;  %v658_v33 = vsel %vm655_vm9, %v657_v26, %v653_v23  ;;  %vm637_vm11 = vmor %vm635_vm10, %vm636_vm7  ;;  %v626_v44 = vand.u32 2147483648, %v533_v12 }
 0x2cd   :  { %v632_v17 = vsub.f32 1.0, %v631_v11  ;;  %v599_v27 = vmul.f32 %v1406_v52, %v598_v25  ;;  %v584_v52 = vmul.f32 %v1400_v43, %v583_v31  ;;  %v659_v34 = vmul.f32 %v1404_v50, %v658_v33 }
 0x2ce   :  { %v624_v46 = vand.u32 2147483647, %v533_v12  ;;  %vm605_vm15 = vweird.f32 %v1453_v7  ;;  %v611_v43 = vand.u32 2147483648, %v1453_v7  ;;  %v609_v50 = vand.u32 2147483647, %v1453_v7 }
 0x2cf   :  { %v633_v24 = vmul.f32 %v1178_v5, %v632_v17  ;;  %1112 = vmatpush.xpose.msk.msrb.mxu3 %vm467_vm2, %v599_v27  ;;  %vm620_vm3 = vweird.f32 %v533_v12  ;;  %v627_v51 = vor.u32 1.1754944e-38, %v626_v44  ;;  %v780_v15 = vperm.slane %v1520_v14, 0  ;;  %v908_v27 = vld [vmem:[%s1613_s5 + $0x38] sm:$0xff] }
 0x2d0   :  { %vm625_vm5 = vcmp.eq.f32.partialorder %v624_v46, 8.507059e+37  ;;  %v612_v54 = vor.u32 1.1754944e-38, %v611_v43  ;;  %vm610_vm6 = vcmp.eq.f32.partialorder %v609_v50, 8.507059e+37  ;;  %v904_v44 = vld [vmem:[%s1613_s5 + $0x18] sm:$0xff]  ;;  %v902_v46 = vld [vmem:[%s1613_s5 + $0x8] sm:$0xff]  ;;  %vm973_vm7 = vcmask 523264  }
 0x2d1   :  { %v1180_v28 = vpop.eup %1179  ;;  %v634_v29 = vadd.f32 %v1178_v5, %v633_v24  ;;  %v1220_v24 = vmov 32.0   ;;  %v971_v50 = vld [vmem:[%s1615_s7 + $0x18] sm:$0xff] }
 0x2d2   :  { %v1182_v32 = vpop.eup %1181  ;;  %v601_v36 = vmul.f32 %v1180_v28, %v1453_v7  ;;  %vm606_vm13 = vweird.f32 %v1180_v28  ;;  %1183 = vrcp.f32 %v1220_v24 }
 0x2d3   :  { %v616_v37 = vmul.f32 %v1182_v32, %v533_v12  ;;  %v638_v38 = vsel %vm637_vm11, %v1178_v5, %v634_v29  ;;  %1113 = vmatpush.xpose.msk.msrb.mxu3 %vm467_vm2, %v584_v52  ;;  %vm621_vm14 = vweird.f32 %v1182_v32  ;;  %vm1485_vm1 = vmor %vm605_vm15, %vm606_vm13 }
 0x2d4   :  { %v602_v39 = vsub.f32 1.0, %v601_v36  ;;  %v643_v40 = vsel %vm640_vm12, %v642_v35, %v638_v38  ;;  %vm622_vm4 = vmor %vm620_vm3, %vm621_vm14 }
 0x2d5   :  { %v617_v41 = vsub.f32 1.0, %v616_v37  ;;  %v644_v47 = vmul.f32 %v1412_v63, %v643_v40 }
 0x2d6   :  { %v603_v42 = vmul.f32 %v1180_v28, %v602_v39 }
 0x2d7   :  { %v618_v45 = vmul.f32 %v1182_v32, %v617_v41  ;;  %1118 = vmatpush.xpose.msk.msra.mxu3 %vm467_vm2, %v659_v34  ;;  %v907_v41 = vld [vmem:[%s1613_s5 + $0x30] sm:$0xff]  ;;  %v906_v34 = vld [vmem:[%s1613_s5 + $0x28] sm:$0xff] }
 0x2d8   :  { %v604_v48 = vadd.f32 %v1180_v28, %v603_v42  ;;  %v1184_v25 = vpop.eup %1183  ;;  %v905_v42 = vld [vmem:[%s1613_s5 + $0x20] sm:$0xff] }
 0x2d9   :  { %v619_v30 = vadd.f32 %v1182_v32, %v618_v45  ;;  %v851_v26 = vmul.f32 32.0, %v1184_v25  ;;  %v903_v45 = vld [vmem:[%s1613_s5 + $0x10] sm:$0xff] }
 0x2da   :  { %v608_v63 = vsel %vm1485_vm1, %v1180_v28, %v604_v48 }
 0x2db   :  { %v623_v53 = vsel %vm622_vm4, %v1182_v32, %v619_v30  ;;  %1119 = vmatpush.xpose.msk.msra.mxu3 %vm467_vm2, %v644_v47  ;;  %v613_v62 = vsel %vm610_vm6, %v612_v54, %v608_v63  ;;  %v901_v47 = vld [vmem:[%s1613_s5] sm:$0xff]  ;;  %v970_v30 = vld [vmem:[%s1615_s7 + $0x10] sm:$0xff] }
 0x2dc   :  { %v628_v55 = vsel %vm625_vm5, %v627_v51, %v623_v53  ;;  %v614_v1 = vmul.f32 %v1418_v4, %v613_v62  ;;  %v778_v4 = vld [vmem:[%s1612_s4 + $0x10] sm:$0xff] }
 0x2dd   :  { %v108_v56 = vpop.permute.xlu0 %107  ;;  %v629_v57 = vmul.f32 %v1416_v2, %v628_v55  ;;  %v779_v2 = vld [vmem:[%s1612_s4 + $0x18] sm:$0xff]  ;;  %v969_v55 = vld [vmem:[%s1615_s7 + $0x8] sm:$0xff] }
 0x2de   :  { %v208_v61 = vadd.f32 %v1368_v58, %v108_v56  ;;  %831 = vmatpush.msrb.mxu1 %v779_v2 }
 0x2df   :  { %1115 = vmatpush.xpose.msk.msra.mxu2 %vm467_vm2, %v629_v57 }
 0x2e0   :  { %1114 = vmatmul.msk.f32.vlgmr.msrb.gmra.mxu3 %vm467_vm2, %v208_v61  ;;  %832 = vmatpush.msrb.mxu1 %v778_v4  ;;  %v898_v4 = vperm.slane %v1520_v14, 2 }
 0x2e1   :  { %1133 = vmatpush.xpose.msk.msrb.mxu3 %vm973_vm7, %v971_v50 }
 0x2e3   :  { %v113_v5 = vpop.permute.xlu1 %112  ;;  %1116 = vmatpush.xpose.msk.msra.mxu2 %vm467_vm2, %v614_v1 }
 0x2e4   :  { %v211_v6 = vadd.f32 %v1370_v59, %v113_v5  ;;  %v777_v59 = vld [vmem:[%s1612_s4 + $0x8] sm:$0xff] }
 0x2e5   :  { %v118_v7 = vpop.permute.xlu0 %117  ;;  %833 = vmatpush.msrb.mxu1 %v777_v59  ;;  %1134 = vmatpush.xpose.msk.msrb.mxu3 %vm973_vm7, %v970_v30 }
 0x2e6   :  { %v214_v8 = vadd.f32 %v1372_v60, %v118_v7  ;;  %1117 = vmatmul.msk.f32.vlgmr.msra.gmra.mxu2 %vm467_vm2, %v211_v6  ;;  %v776_v60 = vld [vmem:[%s1612_s4] sm:$0xff]  ;;  %v895_v7 = vperm.slane %v1520_v14, 1  ;;  %s1075_s4 = sshll.u32 %s1617_s9, 4  ;;  %s1076_s4 = int_to_ptr.hbm [resolvable:$true] %s1075_s4 }
 0x2e7   :  { %834 = vmatpush.msrb.mxu1 %v776_v60  ;;  %1123 = vmatpush.xpose.msk.msrb.mxu2 %vm120_vm0, %v908_v27 }
 0x2e8   :  { %1120 = vmatmul.msk.f32.vlgmr.msra.gmra.mxu3 %vm467_vm2, %v214_v8  ;;  %vm855_vm2 = vweird.f32 %v1184_v25 }
 0x2e9   :  { %1135 = vmatpush.xpose.msk.msrb.mxu3 %vm973_vm7, %v969_v55 }
 0x2eb   :  { %1124 = vmatpush.xpose.msk.msrb.mxu2 %vm120_vm0, %v907_v41 }
 0x2ef   :  { %1125 = vmatpush.xpose.msk.msrb.mxu2 %vm120_vm0, %v906_v34 }
 0x2f3   :  { %1126 = vmatpush.xpose.msk.msrb.mxu2 %vm120_vm0, %v905_v42 }
 0x2f7   :  { %1127 = vmatpush.xpose.msk.msrb.mxu2 %vm120_vm0, %v904_v44 }
 0x2fb   :  { %1128 = vmatpush.xpose.msk.msrb.mxu2 %vm120_vm0, %v903_v45 }
 0x2ff   :  { %1129 = vmatpush.xpose.msk.msrb.mxu2 %vm120_vm0, %v902_v46 }
 0x303   :  { %1130 = vmatpush.xpose.msk.msrb.mxu2 %vm120_vm0, %v901_v47 }
 0x348   :  { %v686_v58 = vpop.f32.mrf.mxu2 }
 0x349   :  { %781 = vxpose.xlu2.b32.start [1/4] (short) (narrow) %v686_v58, 16 }
 0x363   :  { %v715_v9 = vpop.f32.mrf.mxu3 }
 0x364   :  { %782 = vxpose.xlu2.b32.cont [2/4] (short) (narrow) %v715_v9, 16 }
 0x369   :  { %v744_v10 = vpop.f32.mrf.mxu2 }
 0x36b   :  { %v773_v11 = vpop.f32.mrf.mxu3 }
 0x36c   :  { %783 = vxpose.xlu2.b32.cont [3/4] (short) (narrow) %v744_v10, 16 }
 0x374   :  { %784 = vxpose.xlu2.b32.end [4/4] (short) (narrow) %v773_v11, 16 }
 0x3f5   :  { %v797_v12 = vpop.trf.xlu2 }
 0x3f6   :  { %1121 = vmatmul.msk.f32.vlgmr.msrb.gmra.mxu1 %vm120_vm0, %v797_v12 }
 0x3fd   :  { %v798_v13 = vpop.trf.xlu2 }
 0x3fe   :  { %1122 = vmatmul.msk.f32.gmra.mxu1 %vm120_vm0, %v798_v13 }
 0x473   :  { %v836_v16 = vpop.f32.mrf.mxu1 }
 0x474   :  { %v837_v17 = vadd.f32 %v836_v16, %v780_v15 }
 0x476   :  { %v842_v18 = vadd.f32 %v837_v17, %v1287_v3  ;;  %v852_v3 = vsub.f32 1.0, %v851_v26  ;;  %v968_v17 = vld [vmem:[%s1615_s7] sm:$0xff] }
 0x477   :  { %1136 = vmatpush.xpose.msk.msrb.mxu3 %vm973_vm7, %v968_v17 }
 0x478   :  { %v844_v19 = vsel %vm120_vm0, %v842_v18, 0.0  ;;  %v853_v28 = vmul.f32 %v1184_v25, %v852_v3 }
 0x479   :  { %845 = vadd.xlane.f32.xlu1 %v844_v19 }
 0x47a   :  { %v854_v29 = vadd.f32 %v1184_v25, %v853_v28 }
 0x47b   :  { %v839_v20 = vpop.f32.mrf.mxu1 }
 0x47c   :  { %v840_v21 = vadd.f32 %v839_v20, %v780_v15  ;;  %v1531_v31 = vsel %vm855_vm2, %v1184_v25, %v854_v29  ;;  %v972_v25 = vperm.slane %v1520_v14, 3 }
 0x47e   :  { %v843_v22 = vadd.f32 %v840_v21, %v1277_v0 }
 0x480   :  { %v847_v23 = vsel %vm120_vm0, %v843_v22, 0.0 }
 0x481   :  { %848 = vadd.xlane.f32.xlu0 %v847_v23 }
 0x4ec   :  { %v846_v0 = vpop.xlane.xlu1 %845 }
 0x4ed   :  { %v857_v32 = vmul.f32 %v1531_v31, %v846_v0 }
 0x4ef   :  { %v859_v33 = vsub.f32 %v842_v18, %v857_v32  ;;  %v1150_v18 = vld [vmem:[%s1614_s6] ss:$0 sm:$0xff]  ;;  %s1221_s6 = smov [#allocation2]  }
 0x4f0   :  { %s1073_s7 = sshll.u32 %s1221_s6, 4  ;;  %s1074_s7 = int_to_ptr.vmem [resolvable:$true] %s1073_s7 }
 0x4f1   :  { %v861_v35 = vmul.f32 %v859_v33, %v859_v33 }
 0x4f3   :  { %v863_v36 = vsel %vm120_vm0, %v861_v35, 0.0 }
 0x4f4   :  { %864 = vadd.xlane.f32.xlu1 %v863_v36  ;;  %v849_v37 = vpop.xlane.xlu0 %848 }
 0x4f5   :  { %v858_v38 = vmul.f32 %v1531_v31, %v849_v37 }
 0x4f7   :  { %v860_v39 = vsub.f32 %v843_v22, %v858_v38 }
 0x4f9   :  { %v862_v52 = vmul.f32 %v860_v39, %v860_v39 }
 0x4fb   :  { %v866_v40 = vsel %vm120_vm0, %v862_v52, 0.0 }
 0x4fc   :  { %867 = vadd.xlane.f32.xlu0 %v866_v40 }
 0x567   :  { %v865_v48 = vpop.xlane.xlu1 %864 }
 0x568   :  { %v869_v43 = vmul.f32 %v865_v48, %v1531_v31 }
 0x56a   :  { %v871_v49 = vadd.f32 1e-05, %v869_v43 }
 0x56c   :  { %1185 = vrsqrt.f32 %v871_v49  ;;  %vm879_vm9 = vweird.f32 %v871_v49 }
 0x56f   :  { %v868_v51 = vpop.xlane.xlu0 %867 }
 0x570   :  { %v870_v53 = vmul.f32 %v868_v51, %v1531_v31 }
 0x572   :  { %v1186_v63 = vpop.eup %1185  ;;  %v872_v54 = vadd.f32 1e-05, %v870_v53 }
 0x573   :  { %v874_v56 = vmul.f32 %v1186_v63, %v871_v49  ;;  %vm880_vm8 = vweird.f32 %v1186_v63 }
 0x574   :  { %1187 = vrsqrt.f32 %v872_v54  ;;  %vm881_vm10 = vmor %vm879_vm9, %vm880_vm8  ;;  %vm889_vm12 = vweird.f32 %v872_v54 }
 0x575   :  { %v875_v57 = vmul.f32 %v1186_v63, %v874_v56  ;;  %v1061_v56 = vperm.slane %v1520_v14, 4 }
 0x577   :  { %v876_v61 = vmul.f32 0.5, %v875_v57 }
 0x579   :  { %v877_v62 = vsub.f32 1.5, %v876_v61 }
 0x57a   :  { %v1188_v1 = vpop.eup %1187 }
 0x57b   :  { %v878_v5 = vmul.f32 %v1186_v63, %v877_v62  ;;  %v884_v6 = vmul.f32 %v1188_v1, %v872_v54  ;;  %vm890_vm11 = vweird.f32 %v1188_v1 }
 0x57c   :  { %vm891_vm13 = vmor %vm889_vm12, %vm890_vm11 }
 0x57d   :  { %v882_v8 = vsel %vm881_vm10, %v1186_v63, %v878_v5  ;;  %v885_v58 = vmul.f32 %v1188_v1, %v884_v6 }
 0x57e   :  { %v893_v2 = vmul.f32 %v882_v8, %v859_v33 }
 0x57f   :  { %v886_v59 = vmul.f32 0.5, %v885_v58 }
 0x580   :  { %v896_v60 = vmul.f32 %v895_v7, %v893_v2 }
 0x581   :  { %v887_v9 = vsub.f32 1.5, %v886_v59 }
 0x582   :  { %v899_v10 = vadd.f32 %v898_v4, %v896_v60 }
 0x583   :  { %v888_v11 = vmul.f32 %v1188_v1, %v887_v9 }
 0x584   :  { %1131 = vmatmul.msk.f32.vlgmr.msrb.gmra.mxu2 %vm120_vm0, %v899_v10 }
 0x585   :  { %v892_v12 = vsel %vm891_vm13, %v1188_v1, %v888_v11 }
 0x586   :  { %v894_v13 = vmul.f32 %v892_v12, %v860_v39 }
 0x588   :  { %v897_v15 = vmul.f32 %v895_v7, %v894_v13 }
 0x58a   :  { %v900_v16 = vadd.f32 %v898_v4, %v897_v15 }
 0x58c   :  { %1132 = vmatmul.msk.f32.gmra.mxu2 %vm120_vm0, %v900_v16 }
 0x607   :  { %v960_v19 = vpop.f32.mrf.mxu2 }
 0x608   :  { %v961_v20 = vadd.f32 %v1150_v18, %v960_v19 }
 0x60a   :  { %v966_v21 = vmax.f32 %v961_v20, 0.0 }
 0x60c   :  { %1137 = vmatmul.msk.f32.vlgmr.msrb.gmra.mxu3 %vm973_vm7, %v966_v21 }
 0x60f   :  { %v963_v22 = vpop.f32.mrf.mxu2 }
 0x610   :  { %v964_v23 = vadd.f32 %v1150_v18, %v963_v22 }
 0x612   :  { %v967_v24 = vmax.f32 %v964_v23, 0.0 }
 0x614   :  { %1138 = vmatmul.msk.f32.gmra.mxu3 %vm973_vm7, %v967_v24 }
 0x68f   :  { %v1009_v26 = vpop.f32.mrf.mxu3 }
 0x690   :  { %v1010_v27 = vadd.f32 %v1009_v26, %v972_v25 }
 0x692   :  { %v1015_v3 = vadd.f32 %v1010_v27, %v899_v10 }
 0x694   :  { %v1017_v28 = vsel %vm120_vm0, %v1015_v3, 0.0 }
 0x695   :  { %1018 = vadd.xlane.f32.xlu1 %v1017_v28 }
 0x697   :  { %v1012_v29 = vpop.f32.mrf.mxu3 }
 0x698   :  { %v1013_v0 = vadd.f32 %v1012_v29, %v972_v25 }
 0x69a   :  { %v1016_v32 = vadd.f32 %v1013_v0, %v900_v16 }
 0x69c   :  { %v1020_v33 = vsel %vm120_vm0, %v1016_v32, 0.0 }
 0x69d   :  { %1021 = vadd.xlane.f32.xlu0 %v1020_v33 }
 0x708   :  { %v1019_v35 = vpop.xlane.xlu1 %1018 }
 0x709   :  { %v1023_v36 = vmul.f32 %v1019_v35, %v1531_v31 }
 0x70b   :  { %v1025_v37 = vsub.f32 %v1015_v3, %v1023_v36 }
 0x70d   :  { %v1027_v38 = vmul.f32 %v1025_v37, %v1025_v37 }
 0x70f   :  { %v1029_v39 = vsel %vm120_vm0, %v1027_v38, 0.0 }
 0x710   :  { %1030 = vadd.xlane.f32.xlu2 %v1029_v39  ;;  %v1022_v52 = vpop.xlane.xlu0 %1021 }
 0x711   :  { %v1024_v40 = vmul.f32 %v1022_v52, %v1531_v31 }
 0x713   :  { %v1026_v41 = vsub.f32 %v1016_v32, %v1024_v40 }
 0x715   :  { %v1028_v34 = vmul.f32 %v1026_v41, %v1026_v41 }
 0x717   :  { %v1032_v42 = vsel %vm120_vm0, %v1028_v34, 0.0 }
 0x718   :  { %1033 = vadd.xlane.f32.xlu1 %v1032_v42 }
 0x783   :  { %v1031_v44 = vpop.xlane.xlu2 %1030 }
 0x784   :  { %v1035_v45 = vmul.f32 %v1031_v44, %v1531_v31 }
 0x786   :  { %v1037_v46 = vadd.f32 1e-05, %v1035_v45 }
 0x788   :  { %1189 = vrsqrt.f32 %v1037_v46  ;;  %vm1045_vm15 = vweird.f32 %v1037_v46 }
 0x78b   :  { %v1034_v47 = vpop.xlane.xlu1 %1033 }
 0x78c   :  { %v1036_v48 = vmul.f32 %v1034_v47, %v1531_v31  ;;  %v1064_v31 = vperm.slane %v1520_v14, 5 }
 0x78e   :  { %v1190_v43 = vpop.eup %1189  ;;  %v1038_v49 = vadd.f32 1e-05, %v1036_v48 }
 0x78f   :  { %v1040_v50 = vmul.f32 %v1190_v43, %v1037_v46  ;;  %vm1046_vm14 = vweird.f32 %v1190_v43 }
 0x790   :  { %1191 = vrsqrt.f32 %v1038_v49  ;;  %vm1047_vm1 = vmor %vm1045_vm15, %vm1046_vm14  ;;  %vm1055_vm4 = vweird.f32 %v1038_v49 }
 0x791   :  { %v1041_v30 = vmul.f32 %v1190_v43, %v1040_v50 }
 0x793   :  { %v1042_v51 = vmul.f32 0.5, %v1041_v30 }
 0x795   :  { %v1043_v53 = vsub.f32 1.5, %v1042_v51 }
 0x796   :  { %v1192_v63 = vpop.eup %1191 }
 0x797   :  { %v1044_v54 = vmul.f32 %v1190_v43, %v1043_v53  ;;  %v1050_v55 = vmul.f32 %v1192_v63, %v1038_v49  ;;  %vm1056_vm3 = vweird.f32 %v1192_v63 }
 0x798   :  { %vm1057_vm5 = vmor %vm1055_vm4, %vm1056_vm3 }
 0x799   :  { %v1048_v57 = vsel %vm1047_vm1, %v1190_v43, %v1044_v54  ;;  %v1051_v61 = vmul.f32 %v1192_v63, %v1050_v55 }
 0x79a   :  { %v1059_v62 = vmul.f32 %v1048_v57, %v1025_v37 }
 0x79b   :  { %v1052_v1 = vmul.f32 0.5, %v1051_v61 }
 0x79c   :  { %v1062_v5 = vmul.f32 %v1061_v56, %v1059_v62 }
 0x79d   :  { %v1053_v6 = vsub.f32 1.5, %v1052_v1 }
 0x79e   :  { %v1065_v7 = vadd.f32 %v1064_v31, %v1062_v5 }
 0x79f   :  { %v1054_v8 = vmul.f32 %v1192_v63, %v1053_v6 }
 0x7a0   :  { %1067 = vst.msk [vmem:[#allocation2] sm:$0xff] %vm120_vm0, %v1065_v7 }
 0x7a1   :  { %v1058_v58 = vsel %vm1057_vm5, %v1192_v63, %v1054_v8 }
 0x7a2   :  { %v1060_v2 = vmul.f32 %v1058_v58, %v1026_v41 }
 0x7a4   :  { %v1063_v4 = vmul.f32 %v1061_v56, %v1060_v2 }
 0x7a6   :  { %v1066_v14 = vadd.f32 %v1064_v31, %v1063_v4 }
 0x7a8   :  { %1068 = vst.msk [vmem:[#allocation2 + $0x8] sm:$0xff] %vm120_vm0, %v1066_v14 }
 0x7a9   :  { %1081 = dma.vmem_to_hbm [thread:$0]  %s1074_s7, 256, %s1076_s4, [#allocation3], %s1222_s8, %s1222_s8, %s1223_s27  }
 0x7aa   :  { %1217 = dma.done.wait [#allocation3], 256  }
 0x7ab   :  { %1218 = vsyncadd [#allocation3], 4294967040 }
 0x7ac   :  { %1086 = vsyncpa [#allocation3], 1 }

</bundles_post_ra>
